<compile_context>
chip_gen: v7x
topology: tpu7x:2x2x1
jax: 0.10.0
libtpu: 0.0.40
codegen_flags: <defaults>
</compile_context>

<pallas_src>
import jax
import jax.numpy as jnp
from jax.experimental import pallas as pl
from jax.experimental.pallas import tpu as pltpu


def _round_up(a: int, b: int) -> int:
    return ((a + b - 1) // b) * b


def _cdiv(a: int, b: int) -> int:
    return -(-a // b)


def _choose_tiles(N: int, tn: int):
    """Pick (tile_rows, padded_N) so the grid divides N with <=7 pad rows/tile."""
    N8 = _round_up(max(N, 1), 8)
    m = _cdiv(N8, max(tn, 8))          # grid steps at the requested tile size
    if N8 >= 16:
        m = max(m, 2)                  # >=2 steps so both v7x TensorCores get work
        m = _round_up(m, 2)            # even step count balances the two cores
    tn_eff = _round_up(_cdiv(N8, m), 8)
    n_pad = m * tn_eff
    return tn_eff, n_pad


def _vertex_conv_kernel(x_ref, w1bd_ref, b1_ref, gmat_ref, w2e_ref,
                        rmat_ref, b2_ref, o_ref):
    # x_ref   : (tn, k*d)   lane-dense tile of vertices (bf16)
    # w1bd_ref: (k*d, k*k)  block-diagonal grouped-conv weight (bf16)
    # b1_ref  : (1, k*k)    grouped-conv bias, flattened (f32)
    # gmat_ref: (k*k, k*k)  group-sum broadcast matrix (bf16, exact 0/1)
    # w2e_ref : (k*k, k*d)  fused w2-contraction + lane-expansion matrix (bf16)
    # rmat_ref: (k*d, d)    per-d reduction matrix (bf16, exact 0/1)
    # b2_ref  : (1,)        1x1-conv bias (SMEM scalar, f32)
    # o_ref   : (tn, d)
    f32 = jnp.float32
    bf16 = jnp.bfloat16

    xb = x_ref[...]                                               # (tn, k*d) bf16

    # Grouped conv as one dense single-pass bf16 MXU matmul (f32 accumulate).
    scores = jnp.dot(xb, w1bd_ref[...],
                     preferred_element_type=f32) + b1_ref[...]    # (tn, k*k) f32

    # Softmax over each group of k lanes.  The per-row max over all k*k lanes
    # is constant within every group, so subtracting it is mathematically
    # equivalent to the per-group max and needs a single lane-reduce.
    m = jnp.max(scores, axis=-1, keepdims=True)                   # (tn, 1)
    ex = jnp.exp(scores - m)                                      # (tn, k*k) f32
    gs = jnp.dot(ex.astype(bf16), gmat_ref[...],
                 preferred_element_type=f32)                      # group sums
    gs = jnp.maximum(gs, jnp.float32(1e-30))                      # NaN guard (0*inf)
    inv = pl.reciprocal(gs, approx=True)                          # EUP vrcp
    inv = inv * (2.0 - gs * inv)                                  # Newton -> ~f32 exact
    mult = ex * inv                                               # softmax (tn, k*k)

    # cexp[n, j*d+dd] = sum_i w2[i] * mult[n, i*k+j]   (fused w2s @ emat)
    cexp = jnp.dot(mult.astype(bf16), w2e_ref[...],
                   preferred_element_type=f32)                    # (tn, k*d)

    # out[n,dd] = sum_j cexp[n, j*d+dd] * x[n, j*d+dd] + b2
    prod = cexp * xb.astype(f32)                                  # f32 VPU multiply
    out = jnp.dot(prod.astype(bf16), rmat_ref[...],
                  preferred_element_type=f32) + b2_ref[0]         # (tn, d)

    o_ref[...] = out.astype(o_ref.dtype)


def vertex_conv(x, w1, b1, w2, b2, *, tn=2048, compute_dtype=jnp.bfloat16):
    """VertexConv forward.

    x : (N, k, d) region features
    w1: (k, k, d) convKK weight (Conv1d(k, k*k, d, groups=k) reshaped)
    b1: (k, k)    convKK bias
    w2: (1, k)    convK1 weight (Conv1d(k, 1, 1) reshaped)
    b2: (1, 1)    convK1 bias
    returns (N, d)
    """
    N, k, d = x.shape
    kd, kk = k * d, k * k
    f32 = jnp.float32
    cdt = compute_dtype

    # ---- N tiling: pad only to a multiple of 8; tile divides padded N.
    tn_eff, n_pad = _choose_tiles(N, tn)
    x_flat = x.reshape(N, kd).astype(cdt)          # lane-dense + half HBM bytes
    if n_pad != N:
        x_flat = jnp.pad(x_flat, ((0, n_pad - N), (0, 0)))  # zero rows -> no NaNs

    # ---- small constant matrices, built once (structural 0/1 parts exact in bf16).
    eye_k = jnp.eye(k, dtype=f32)
    # Block-diagonal grouped-conv weight: W1bd[i*d+dd, g*k+j] = w1[i,j,dd]*delta(i,g)
    w1bd = jnp.einsum("ijd,ig->idgj", w1.astype(f32), eye_k).reshape(kd, kk).astype(cdt)
    b1_flat = b1.astype(f32).reshape(1, kk)
    # Group-sum broadcast: gs[n, i*k+j] = sum_j' ex[n, i*k+j']
    gmat = jnp.kron(eye_k, jnp.ones((k, k), f32)).astype(cdt)
    # Fused w2 contraction + lane expansion: cexp[n, j*d+dd] = sum_i w2[i]*mult[n, i*k+j]
    w2s = jnp.kron(w2.astype(f32).reshape(k, 1), eye_k)           # (k*k, k)
    emat = jnp.kron(eye_k, jnp.ones((1, d), f32))                 # (k, k*d)
    w2e = (w2s @ emat).astype(cdt)                                # (k*k, k*d)
    # Reduction over neighbours: out[n, dd] = sum_j prod[n, j*d+dd]
    rmat = jnp.tile(jnp.eye(d, dtype=f32), (k, 1)).astype(cdt)
    b2s = b2.astype(f32).reshape(1)

    # ---- cost estimate for XLA's scheduler (advisory).
    flops = 2 * n_pad * (kd * kk + kk * kk + kk * kd + kd * d)
    bytes_accessed = (n_pad * kd * x_flat.dtype.itemsize          # x in
                      + n_pad * d * jnp.dtype(x.dtype).itemsize   # out
                      + (kd * kk + kk * kk + kk * kd + kd * d) * 2)
    transcendentals = n_pad * kk

    grid = (n_pad // tn_eff,)
    out = pl.pallas_call(
        _vertex_conv_kernel,
        out_shape=jax.ShapeDtypeStruct((n_pad, d), x.dtype),
        grid_spec=pltpu.PrefetchScalarGridSpec(
            num_scalar_prefetch=0,
            grid=grid,
            in_specs=[
                pl.BlockSpec((tn_eff, kd), lambda i: (i, 0)),        # x tile over N
                pl.BlockSpec((kd, kk), lambda i: (0, 0)),            # W1 block-diag
                pl.BlockSpec((1, kk), lambda i: (0, 0)),             # b1
                pl.BlockSpec((kk, kk), lambda i: (0, 0)),            # group-sum mat
                pl.BlockSpec((kk, kd), lambda i: (0, 0)),            # fused w2e
                pl.BlockSpec((kd, d), lambda i: (0, 0)),             # reduction mat
                pl.BlockSpec(memory_space=pltpu.MemorySpace.SMEM),   # b2 scalar
            ],
            out_specs=pl.BlockSpec((tn_eff, d), lambda i: (i, 0)),
        ),
        compiler_params=pltpu.CompilerParams(
            # Independent N tiles: lets the grid shard across both TCs on v7x.
            dimension_semantics=("parallel",),
            vmem_limit_bytes=32 * 1024 * 1024,
        ),
        cost_estimate=pl.CostEstimate(
            flops=int(flops),
            bytes_accessed=int(bytes_accessed),
            transcendentals=int(transcendentals),
        ),
    )(x_flat, w1bd, b1_flat, gmat, w2e, rmat, b2s)
    return out if n_pad == N else out[:N]


if __name__ == "__main__":
    # Small shapes: N vertices, k neighbours, d feature dim.
    # N is deliberately not a multiple of 8 to exercise the padding path.
    N, k, d = 100, 8, 32
    key = jax.random.PRNGKey(0)
    kx, kw1, kb1, kw2, kb2 = jax.random.split(key, 5)

    x = jax.random.normal(kx, (N, k, d), dtype=jnp.float32)
    # Deterministic synthetic parameters (shapes implied by the module's __init__).
    w1 = 0.1 * jax.random.normal(kw1, (k, k, d), dtype=jnp.float32)  # convKK weight
    b1 = 0.1 * jax.random.normal(kb1, (k, k), dtype=jnp.float32)     # convKK bias
    w2 = 0.1 * jax.random.normal(kw2, (1, k), dtype=jnp.float32)     # convK1 weight
    b2 = 0.1 * jax.random.normal(kb2, (1, 1), dtype=jnp.float32)     # convK1 bias

    out = vertex_conv(x, w1, b1, w2, b2)
    out = jax.block_until_ready(out)

    # Pure-JAX f32 reference (mirrors the PyTorch forward exactly).
    scores_ref = jnp.einsum("nid,ijd->nij", x, w1) + b1[None, :, :]
    mult_ref = jax.nn.softmax(scores_ref, axis=-1)
    trans_ref = jnp.einsum("nij,njd->nid", mult_ref, x)
    ref = jnp.einsum("i,nid->nd", w2[0], trans_ref) + b2[0, 0]

    assert out.shape == (N, d)
    # Tolerance reflects the deliberate bf16 transfer + single-pass bf16 MXU
    # dots (f32 accumulate) recommended by the perf review.
    max_err = float(jnp.max(jnp.abs(out - ref)))
    assert jnp.allclose(out, ref, atol=5e-2, rtol=5e-2), (
        f"kernel/reference mismatch, max abs err={max_err}")
    print("KERNEL_OK")
</pallas_src>

<mosaic_0001>
module attributes {stable_mosaic.version = 11 : i64} {
  func.func @_vertex_conv_kernel(%arg0: i32, %arg1: memref<56x256xbf16, #tpu.memory_space<vmem>>, %arg2: memref<256x64xbf16, #tpu.memory_space<vmem>>, %arg3: memref<1x64xf32, #tpu.memory_space<vmem>>, %arg4: memref<64x64xbf16, #tpu.memory_space<vmem>>, %arg5: memref<64x256xbf16, #tpu.memory_space<vmem>>, %arg6: memref<256x32xbf16, #tpu.memory_space<vmem>>, %arg7: memref<1xf32, #tpu.memory_space<smem>>, %arg8: memref<56x32xf32, #tpu.memory_space<vmem>>) attributes {dimension_semantics = [#tpu.dimension_semantics<parallel>], iteration_bounds = array<i64: 2>, scalar_prefetch = 0 : i64, scratch_operands = 0 : i64, tpu.core_type = #tpu.core_type<tc>, window_params = [{transform_indices = @transform_0, window_bounds = array<i64: 56, 256>}, {pipeline_mode = #tpu.pipeline_mode<synchronous>, transform_indices = @transform_1, window_bounds = array<i64: 256, 64>}, {pipeline_mode = #tpu.pipeline_mode<synchronous>, transform_indices = @transform_2, window_bounds = array<i64: 1, 64>}, {pipeline_mode = #tpu.pipeline_mode<synchronous>, transform_indices = @transform_3, window_bounds = array<i64: 64, 64>}, {pipeline_mode = #tpu.pipeline_mode<synchronous>, transform_indices = @transform_4, window_bounds = array<i64: 64, 256>}, {pipeline_mode = #tpu.pipeline_mode<synchronous>, transform_indices = @transform_5, window_bounds = array<i64: 256, 32>}, {transform_indices = @transform_6, window_bounds = array<i64: 1>}, {transform_indices = @transform_7, window_bounds = array<i64: 56, 32>}]} {
    %c0 = arith.constant 0 : index
    %c0_0 = arith.constant 0 : index
    %0 = vector.load %arg1[%c0, %c0_0] : memref<56x256xbf16, #tpu.memory_space<vmem>>, vector<56x256xbf16>
    %c0_1 = arith.constant 0 : index
    %c0_2 = arith.constant 0 : index
    %1 = vector.load %arg2[%c0_1, %c0_2] : memref<256x64xbf16, #tpu.memory_space<vmem>>, vector<256x64xbf16>
    %cst = arith.constant dense<0.000000e+00> : vector<56x64xf32>
    %2 = tpu.matmul %0, %1, %cst {dimension_numbers = #tpu.dot_dimension_numbers<[1], [0], [0], [1], [0, 0, 1, 1], [], []>} : vector<56x256xbf16>, vector<256x64xbf16>, vector<56x64xf32> -> vector<56x64xf32>
    %c0_3 = arith.constant 0 : index
    %c0_4 = arith.constant 0 : index
    %3 = vector.load %arg3[%c0_3, %c0_4] : memref<1x64xf32, #tpu.memory_space<vmem>>, vector<1x64xf32>
    %4 = vector.broadcast %3 : vector<1x64xf32> to vector<56x64xf32>
    %5 = arith.addf %2, %4 : vector<56x64xf32>
    %cst_5 = arith.constant dense<0xFF800000> : vector<56xf32>
    %6 = vector.multi_reduction <maximumf>, %5, %cst_5 [1] : vector<56x64xf32> to vector<56xf32>
    %7 = vector.shape_cast %6 : vector<56xf32> to vector<56x1xf32>
    %8 = vector.broadcast %7 : vector<56x1xf32> to vector<56x64xf32>
    %9 = arith.subf %5, %8 : vector<56x64xf32>
    %10 = math.exp %9 : vector<56x64xf32>
    %11 = arith.truncf %10 : vector<56x64xf32> to vector<56x64xbf16>
    %c0_6 = arith.constant 0 : index
    %c0_7 = arith.constant 0 : index
    %12 = vector.load %arg4[%c0_6, %c0_7] : memref<64x64xbf16, #tpu.memory_space<vmem>>, vector<64x64xbf16>
    %cst_8 = arith.constant dense<0.000000e+00> : vector<56x64xf32>
    %13 = tpu.matmul %11, %12, %cst_8 {dimension_numbers = #tpu.dot_dimension_numbers<[1], [0], [0], [1], [0, 0, 1, 1], [], []>} : vector<56x64xbf16>, vector<64x64xbf16>, vector<56x64xf32> -> vector<56x64xf32>
    %cst_9 = arith.constant 1.000000e-30 : f32
    %14 = vector.broadcast %cst_9 : f32 to vector<56x64xf32>
    %15 = arith.maximumf %13, %14 : vector<56x64xf32>
    %16 = tpu.reciprocal %15 {approx = true} : vector<56x64xf32> -> vector<56x64xf32>
    %17 = arith.mulf %15, %16 : vector<56x64xf32>
    %cst_10 = arith.constant 2.000000e+00 : f32
    %18 = vector.broadcast %cst_10 : f32 to vector<56x64xf32>
    %19 = arith.subf %18, %17 : vector<56x64xf32>
    %20 = arith.mulf %16, %19 : vector<56x64xf32>
    %21 = arith.mulf %10, %20 : vector<56x64xf32>
    %22 = arith.truncf %21 : vector<56x64xf32> to vector<56x64xbf16>
    %c0_11 = arith.constant 0 : index
    %c0_12 = arith.constant 0 : index
    %23 = vector.load %arg5[%c0_11, %c0_12] : memref<64x256xbf16, #tpu.memory_space<vmem>>, vector<64x256xbf16>
    %cst_13 = arith.constant dense<0.000000e+00> : vector<56x256xf32>
    %24 = tpu.matmul %22, %23, %cst_13 {dimension_numbers = #tpu.dot_dimension_numbers<[1], [0], [0], [1], [0, 0, 1, 1], [], []>} : vector<56x64xbf16>, vector<64x256xbf16>, vector<56x256xf32> -> vector<56x256xf32>
    %25 = arith.extf %0 : vector<56x256xbf16> to vector<56x256xf32>
    %26 = arith.mulf %24, %25 : vector<56x256xf32>
    %27 = arith.truncf %26 : vector<56x256xf32> to vector<56x256xbf16>
    %c0_14 = arith.constant 0 : index
    %c0_15 = arith.constant 0 : index
    %28 = vector.load %arg6[%c0_14, %c0_15] : memref<256x32xbf16, #tpu.memory_space<vmem>>, vector<256x32xbf16>
    %cst_16 = arith.constant dense<0.000000e+00> : vector<56x32xf32>
    %29 = tpu.matmul %27, %28, %cst_16 {dimension_numbers = #tpu.dot_dimension_numbers<[1], [0], [0], [1], [0, 0, 1, 1], [], []>} : vector<56x256xbf16>, vector<256x32xbf16>, vector<56x32xf32> -> vector<56x32xf32>
    %c0_17 = arith.constant 0 : index
    %30 = memref.load %arg7[%c0_17] : memref<1xf32, #tpu.memory_space<smem>>
    %31 = vector.broadcast %30 : f32 to vector<56x32xf32>
    %32 = arith.addf %29, %31 : vector<56x32xf32>
    %c0_18 = arith.constant 0 : index
    %c0_19 = arith.constant 0 : index
    %33 = vector.load %arg8[%c0_18, %c0_19] : memref<56x32xf32, #tpu.memory_space<vmem>>, vector<56x32xf32>
    tpu.vector_store %arg8[%c0_18, %c0_19], %32 {strides = array<i32>} : memref<56x32xf32, #tpu.memory_space<vmem>>, vector<56x32xf32>,
    return
  }
  func.func @transform_0(%arg0: i32) -> (i32, i32) {
    %c0_i32 = arith.constant 0 : i32
    %c0_i32_0 = arith.constant 0 : i32
    return %arg0, %c0_i32 : i32, i32
  }
  func.func @transform_1(%arg0: i32) -> (i32, i32) {
    %c0_i32 = arith.constant 0 : i32
    %c0_i32_0 = arith.constant 0 : i32
    %c0_i32_1 = arith.constant 0 : i32
    return %c0_i32, %c0_i32_0 : i32, i32
  }
  func.func @transform_2(%arg0: i32) -> (i32, i32) {
    %c0_i32 = arith.constant 0 : i32
    %c0_i32_0 = arith.constant 0 : i32
    %c0_i32_1 = arith.constant 0 : i32
    return %c0_i32, %c0_i32_0 : i32, i32
  }
  func.func @transform_3(%arg0: i32) -> (i32, i32) {
    %c0_i32 = arith.constant 0 : i32
    %c0_i32_0 = arith.constant 0 : i32
    %c0_i32_1 = arith.constant 0 : i32
    return %c0_i32, %c0_i32_0 : i32, i32
  }
  func.func @transform_4(%arg0: i32) -> (i32, i32) {
    %c0_i32 = arith.constant 0 : i32
    %c0_i32_0 = arith.constant 0 : i32
    %c0_i32_1 = arith.constant 0 : i32
    return %c0_i32, %c0_i32_0 : i32, i32
  }
  func.func @transform_5(%arg0: i32) -> (i32, i32) {
    %c0_i32 = arith.constant 0 : i32
    %c0_i32_0 = arith.constant 0 : i32
    %c0_i32_1 = arith.constant 0 : i32
    return %c0_i32, %c0_i32_0 : i32, i32
  }
  func.func @transform_6(%arg0: i32) -> i32 {
    %c0_i32 = arith.constant 0 : i32
    %c0_i32_0 = arith.constant 0 : i32
    return %c0_i32 : i32
  }
  func.func @transform_7(%arg0: i32) -> (i32, i32) {
    %c0_i32 = arith.constant 0 : i32
    %c0_i32_0 = arith.constant 0 : i32
    return %arg0, %c0_i32 : i32, i32
  }
}

</mosaic_0001>

<bundles_post_ra>
// kernel: tpu_custom_call.1
= control target key start
LH: loop header
LB: loop body
LE: loop exit
PB: predicated region body
PF: predicated region fallthrough
CT: control target
= control target key end

     0   :  { %s1493_s26 = smov 0   ;;  %s1813_s0 = inlined_call_operand.vmem [shape: bf16[112,256], index: 0, kind: input, shape index: {}]   ;;  %s1814_s1 = inlined_call_operand.vmem [shape: bf16[256,64], index: 1, kind: input, shape index: {}]   ;;  %s1815_s2 = inlined_call_operand.vmem [shape: f32[1,64], index: 2, kind: input, shape index: {}]   ;;  %s1816_s3 = inlined_call_operand.vmem [shape: bf16[64,64], index: 3, kind: input, shape index: {}]   ;;  %s1817_s4 = inlined_call_operand.vmem [shape: bf16[64,256], index: 4, kind: input, shape index: {}]   ;;  %s1818_s5 = inlined_call_operand.vmem [shape: bf16[256,32], index: 5, kind: input, shape index: {}]   ;;  %s1819_s6 = inlined_call_operand.<no memory space> [shape: f32[1], index: 6, kind: input, shape index: {}]   ;;  %s1820_s7 = inlined_call_operand.vmem [shape: f32[112,32], index: 7, kind: output, shape index: {}]  }
   0x1   :  { %12 = sst [smem:[#allocation2]] %s1819_s6 }
   0x2 LB: > { %s1156_s27 = sadd.s32 4294967295, %s1447_s26   ;;  %p1160_p0 = scmp.ge.s32.totalorder %s1447_s26, 1  ;;  %s1447_s26 = sphi %s1493_s26, %s18_s26  }
   0x3   : > { %p240_p1 = scmp.lt.s32.totalorder %s1447_s26, 3 }
   0x5   : > { %p241_p2 = pnand %p1160_p0, %p240_p1 }
   0x6   : > { %v1357_v0 = vld [vmem:[%s1814_s1 + $0x40] sm:$0xff] (!%p241_p2)   ;;  %s273_s6 = smul.u32 (!%p241_p2), 7, %s1156_s27  ;;  %v1359_v2 = vld [vmem:[%s1814_s1 + $0x48] sm:$0xff] (!%p241_p2)   ;;  %v1361_v4 = vld [vmem:[%s1814_s1 + $0x50] sm:$0xff] (!%p241_p2)   ;;  %vm530_vm0 = vcmask (!%p241_p2), 523264   ;;  %s930_s14 = sld [smem:[#allocation2]] (!%p241_p2) }
   0x7   : > { %244 = sbr.rel (%p241_p2) target bundleno = 1128 (0x468), region = 48  ;;  %v1358_v1 = vld [vmem:[%s1814_s1] sm:$0xff] (!%p241_p2)   ;;  %1228 = vmatprep.subr.bf16.mxu0 (!%p241_p2), %v1357_v0  ;;  %v1360_v3 = vld [vmem:[%s1814_s1 + $0x8] sm:$0xff] (!%p241_p2)   ;;  %v1362_v5 = vld [vmem:[%s1814_s1 + $0x10] sm:$0xff] (!%p241_p2)   ;;  %vm1092_vm1 = vcmask (!%p241_p2), 261120  }
   0x8   : > { %p274_p3 = scmp.lt.s32.totalorder (!%p241_p2), %s273_s6, 13  ;;  %1229 = vmatpush3.bf16.msra.mxu0 (!%p241_p2), %v1358_v1  ;;  %v1363_v6 = vld [vmem:[%s1814_s1 + $0x58] sm:$0xff] (!%p241_p2)   ;;  %v1365_v8 = vld [vmem:[%s1814_s1 + $0x60] sm:$0xff] (!%p241_p2)   ;;  %v1367_v10 = vld [vmem:[%s1814_s1 + $0x68] sm:$0xff] (!%p241_p2)  }
   0x9   : > { %1230 = vmatprep.subr.bf16.mxu0 (!%p241_p2), %v1359_v2  ;;  %v1364_v7 = vld [vmem:[%s1814_s1 + $0x18] sm:$0xff] (!%p241_p2)   ;;  %v1366_v9 = vld [vmem:[%s1814_s1 + $0x20] sm:$0xff] (!%p241_p2)   ;;  %v1368_v13 = vld [vmem:[%s1814_s1 + $0x28] sm:$0xff] (!%p241_p2)  }
   0xa   : > { %v1369_v15 = vld [vmem:[%s1814_s1 + $0x70] sm:$0xff] (!%p241_p2)   ;;  %v1371_v17 = vld [vmem:[%s1814_s1 + $0x78] sm:$0xff] (!%p241_p2)   ;;  %v1164_v33 = vld [vmem:[%s1815_s2] ss:$0 sm:$0xff] (!%p241_p2) }
   0xb   : > { %v1370_v16 = vld [vmem:[%s1814_s1 + $0x30] sm:$0xff] (!%p241_p2)   ;;  %v1372_v18 = vld [vmem:[%s1814_s1 + $0x38] sm:$0xff] (!%p241_p2)  }
   0xc   : > { %1231 = vmatpush3.bf16.msra.mxu0 (!%p241_p2), %v1360_v3 }
   0xd   : > { %1232 = vmatprep.subr.bf16.mxu0 (!%p241_p2), %v1361_v4 }
   0xe   : > { %s1822_s6 = smov (!%p274_p3, %s273_s6), 13 }
   0xf   : > { %s1227_s19 = sshll.u32 %s1822_s6, 3 }
  0x10   : > { %1233 = vmatpush3.bf16.msra.mxu0 %v1362_v5  ;;  %s1536_s27 = scalar_lea.vmem %s1813_s0, %s1227_s19  ;;  %v1381_v5 = vld [vmem:[%s1816_s3] sm:$0xff]   ;;  %s1794_s17 = scalar_lea.vmem %s1820_s7, %s1227_s19 }
  0x11   : > { %1234 = vmatprep.subr.bf16.mxu0 %v1363_v6  ;;  %v1545_v11 = vld [vmem:[%s1536_s27] sm:$0xff]  ;;  %v1548_v12 = vld [vmem:[%s1536_s27 + $0x8] sm:$0xff]  ;;  %v1568_v19 = vld [vmem:[%s1536_s27 + $0x10] sm:$0xff]  ;;  %1316 = vmatprep.subr.bf16.mxu1 %v1381_v5 }
  0x12   : > { %v1166_v14 = vcombine.high %v1545_v11, %v1548_v12  ;;  %v1571_v20 = vld [vmem:[%s1536_s27 + $0x18] sm:$0xff]  ;;  %v1165_v21 = vcombine.low %v1545_v11, %v1548_v12  ;;  %v1578_v23 = vld [vmem:[%s1536_s27 + $0x20] sm:$0xff]  ;;  %v1581_v24 = vld [vmem:[%s1536_s27 + $0x28] sm:$0xff]  ;;  %1317 = vmatpush3.bf16.msra.mxu1 %v1381_v5 }
  0x13   : > { %v1168_v22 = vcombine.high %v1568_v19, %v1571_v20  ;;  %v1167_v25 = vcombine.low %v1568_v19, %v1571_v20  ;;  %v1170_v26 = vcombine.high %v1578_v23, %v1581_v24  ;;  %v1588_v27 = vld [vmem:[%s1536_s27 + $0x30] sm:$0xff]  ;;  %v1169_v28 = vcombine.low %v1578_v23, %v1581_v24  ;;  %v1382_v6 = vld [vmem:[%s1816_s3 + $0x8] sm:$0xff]  }
  0x14   : > { %1235 = vmatpush3.bf16.msra.mxu0 %v1364_v7  ;;  %498 = vmatprep.mubr.bf16.mxu0 %v1166_v14  ;;  %v1172_v29 = vcombine.high %v1588_v27, %v1588_v27  ;;  %v1171_v30 = vcombine.low %v1588_v27, %v1588_v27  ;;  %v1383_v7 = vld [vmem:[%s1816_s3 + $0x10] sm:$0xff]  }
  0x15   : > { %1236 = vmatprep.subr.bf16.mxu0 %v1365_v8  ;;  %1318 = vmatprep.subr.bf16.mxu1 %v1382_v6  ;;  %v1384_v8 = vld [vmem:[%s1816_s3 + $0x18] sm:$0xff]  }
  0x16   : > { %1319 = vmatpush3.bf16.msra.mxu1 %v1382_v6 }
  0x17   : > { %1320 = vmatprep.subr.bf16.mxu1 %v1383_v7 }
  0x18   : > { %1237 = vmatpush3.bf16.msra.mxu0 %v1366_v9 }
  0x19   : > { %1238 = vmatprep.subr.bf16.mxu0 %v1367_v10 }
  0x1a   : > { %1321 = vmatpush3.bf16.msra.mxu1 %v1383_v7 }
  0x1b   : > { %1322 = vmatprep.subr.bf16.mxu1 %v1384_v8 }
  0x1c   : > { %1239 = vmatpush3.bf16.msra.mxu0 %v1368_v13 }
  0x1d   : > { %1240 = vmatprep.subr.bf16.mxu0 %v1369_v15 }
  0x1e   : > { %1323 = vmatpush3.bf16.msra.mxu1 %v1384_v8 }
  0x20   : > { %1241 = vmatpush3.bf16.msra.mxu0 %v1370_v16 }
  0x21   : > { %1242 = vmatprep.subr.bf16.mxu0 %v1371_v17 }
  0x24   : > { %1243 = vmatpush3.bf16.msra.mxu0 %v1372_v18 }
  0x27   : > { %499 = vmatmul.mubr.bf16.vlgmr.msra.gmra.mrb[0].mxu0 %v1165_v21 }
  0x28   : > { %506 = vmatprep.mubr.bf16.mxu0 %v1168_v22 }
  0x2f   : > { %507 = vmatmul.mubr.bf16.gmra.mrb[4].mxu0 %v1167_v25 }
  0x30   : > { %514 = vmatprep.mubr.bf16.mxu0 %v1170_v26 }
  0x37   : > { %515 = vmatmul.mubr.bf16.gmra.mrb[8].mxu0 %v1169_v28 }
  0x38   : > { %522 = vmatprep.mubr.bf16.mxu0 %v1172_v29 }
  0x3f   : > { %523 = vmatmul.mubr.bf16.gmra.mrb[12].mxu0 %v1171_v30 }
  0xfa   : > { %v1244_v31 = vpop.f32.mrb[0].mxu0 }
  0xfb   : > { %v1245_v32 = vpop.f32.mrb[1].mxu0 }
  0xfc   : > { %v1246_v34 = vadd.f32 %v1245_v32, %v1244_v31  ;;  %v1247_v35 = vpop.f32.mrb[2].mxu0 }
  0xfd   : > { %v1248_v36 = vpop.f32.mrb[3].mxu0 }
  0xfe   : > { %v1249_v37 = vadd.f32 %v1248_v36, %v1247_v35  ;;  %v501_v38 = vadd.f32 %v1246_v34, %v1164_v33 }
 0x100   : > { %v531_v39 = vsel %vm530_vm0, %v501_v38, -inf  ;;  %v504_v40 = vadd.f32 %v1249_v37, %v1164_v33 }
 0x101   : > { %532 = vmax.xlane.f32.xlu0 %v531_v39 }
 0x102   : > { %v1250_v41 = vpop.f32.mrb[4].mxu0  ;;  %v534_v45 = vsel %vm530_vm0, %v504_v40, -inf }
 0x103   : > { %v1251_v42 = vpop.f32.mrb[5].mxu0 }
 0x104   : > { %v1252_v43 = vadd.f32 %v1251_v42, %v1250_v41  ;;  %v1253_v44 = vpop.f32.mrb[6].mxu0 }
 0x105   : > { %v1254_v46 = vpop.f32.mrb[7].mxu0  ;;  %535 = vmax.xlane.f32.xlu0 %v534_v45 }
 0x106   : > { %v1255_v47 = vadd.f32 %v1254_v46, %v1253_v44  ;;  %v509_v48 = vadd.f32 %v1252_v43, %v1164_v33 }
 0x108   : > { %v537_v49 = vsel %vm530_vm0, %v509_v48, -inf  ;;  %v512_v50 = vadd.f32 %v1255_v47, %v1164_v33 }
 0x109   : > { %538 = vmax.xlane.f32.xlu1 %v537_v49  ;;  %v1385_v49 = vld [vmem:[%s1817_s4] ss:$8 sps:$4 sm:$0xff]  }
 0x10a   : > { %v1256_v51 = vpop.f32.mrb[8].mxu0  ;;  %v540_v55 = vsel %vm530_vm0, %v512_v50, -inf }
 0x10b   : > { %v1257_v52 = vpop.f32.mrb[9].mxu0 }
 0x10c   : > { %v1258_v53 = vadd.f32 %v1257_v52, %v1256_v51  ;;  %v1259_v54 = vpop.f32.mrb[10].mxu0  ;;  %v1388_v51 = vld [vmem:[%s1817_s4 + $0x10] ss:$8 sps:$4 sm:$0xff]   ;;  %v1393_v52 = vld [vmem:[%s1817_s4 + $0x24] ss:$8 sps:$4 sm:$0xff]  }
 0x10d   : > { %v1260_v56 = vpop.f32.mrb[11].mxu0  ;;  %541 = vmax.xlane.f32.xlu1 %v540_v55  ;;  %v1394_v55 = vld [vmem:[%s1817_s4 + $0x30] ss:$8 sps:$4 sm:$0xff]  }
 0x10e   : > { %v1261_v57 = vadd.f32 %v1260_v56, %v1259_v54  ;;  %v517_v58 = vadd.f32 %v1258_v53, %v1164_v33  ;;  %v1391_v53 = vld [vmem:[%s1817_s4 + $0x20] ss:$8 sps:$4 sm:$0xff]   ;;  %v1396_v54 = vld [vmem:[%s1817_s4 + $0x34] ss:$8 sps:$4 sm:$0xff]   ;;  %v1449_v56 = vmov 0  }
 0x110   : > { %v543_v59 = vsel %vm530_vm0, %v517_v58, -inf  ;;  %v520_v60 = vadd.f32 %v1261_v57, %v1164_v33  ;;  %v1397_v57 = vld [vmem:[%s1818_s5 + $0x40] sm:$0xff]  }
 0x111   : > { %544 = vmax.xlane.f32.xlu0 %v543_v59  ;;  %v1680_v59 = vld [vmem:[%s1818_s5 + $0x48] sm:$0xff]   ;;  %1276 = vmatprep.subr.bf16.mxu0 %v1397_v57 }
 0x112   : > { %v1262_v61 = vpop.f32.mrb[12].mxu0  ;;  %v546_v62 = vsel %vm530_vm0, %v520_v60, -inf }
 0x113   : > { %v1263_v63 = vpop.f32.mrb[13].mxu0  ;;  %547 = vmax.xlane.f32.xlu1 %v546_v62  ;;  %v1698_v62 = vld [vmem:[%s1818_s5 + $0x10] sm:$0xff]  }
 0x114   : > { %v1264_v0 = vadd.f32 %v1263_v63, %v1262_v61  ;;  %v1265_v1 = vpop.f32.mrb[14].mxu0  ;;  %v1692_v61 = vld [vmem:[%s1818_s5 + $0x50] sm:$0xff]   ;;  %v1704_v63 = vld [vmem:[%s1818_s5 + $0x58] sm:$0xff]  }
 0x115   : > { %v1266_v2 = vpop.f32.mrb[15].mxu0  ;;  %v1716_v1 = vld [vmem:[%s1818_s5 + $0x60] sm:$0xff]  }
 0x116   : > { %v525_v3 = vadd.f32 %v1264_v0, %v1164_v33  ;;  %v1710_v0 = vld [vmem:[%s1818_s5 + $0x18] sm:$0xff]   ;;  %v1722_v2 = vld [vmem:[%s1818_s5 + $0x20] sm:$0xff]  }
 0x118   : > { %v549_v4 = vsel %vm530_vm0, %v525_v3, -inf }
 0x119   : > { %550 = vmax.xlane.f32.xlu0 %v549_v4  ;;  %v1734_v4 = vld [vmem:[%s1818_s5 + $0x28] sm:$0xff]  }
 0x18e   : > { %v533_v9 = vpop.xlane.xlu0 %532 }
 0x18f   : > { %v552_v10 = vsub.f32 %v501_v38, %v533_v9 }
 0x191   : > { %v559_v13 = vmul.f32 1.442695, %v552_v10 }
 0x192   : > { %v536_v14 = vpop.xlane.xlu0 %535 }
 0x193   : > { %v553_v15 = vsub.f32 %v504_v40, %v536_v14  ;;  %1413 = vpow2.f32 %v559_v13 }
 0x195   : > { %v561_v16 = vmul.f32 1.442695, %v553_v15 }
 0x196   : > { %v539_v17 = vpop.xlane.xlu1 %538 }
 0x197   : > { %1415 = vpow2.f32 %v561_v16  ;;  %v554_v18 = vsub.f32 %v509_v48, %v539_v17  ;;  %v1387_v48 = vld [vmem:[%s1817_s4 + $0x4] ss:$8 sps:$4 sm:$0xff]  }
 0x198   : > { %791 = vmatprep.subr.bf16.mxu1 %v1387_v48 }
 0x199   : > { %v563_v21 = vmul.f32 1.442695, %v554_v18 }
 0x19a   : > { %v542_v22 = vpop.xlane.xlu1 %541 }
 0x19b   : > { %v555_v25 = vsub.f32 %v512_v50, %v542_v22  ;;  %1417 = vpow2.f32 %v563_v21  ;;  %v1390_v50 = vld [vmem:[%s1817_s4 + $0x14] ss:$8 sps:$4 sm:$0xff]  }
 0x19d   : > { %v565_v26 = vmul.f32 1.442695, %v555_v25  ;;  %v1618_v30 = vpop.eup %1413 }
 0x19e   : > { %v545_v28 = vpop.xlane.xlu0 %544 }
 0x19f   : > { %1419 = vpow2.f32 %v565_v26  ;;  %v556_v29 = vsub.f32 %v517_v58, %v545_v28  ;;  %v1675_v58 = vld [vmem:[%s1818_s5] sm:$0xff]  }
 0x1a0   : > { %v548_v31 = vpop.xlane.xlu1 %547  ;;  %1277 = vmatpush3.bf16.msra.mxu0 %v1675_v58 }
 0x1a1   : > { %v1620_v32 = vpop.eup %1415  ;;  %v567_v33 = vmul.f32 1.442695, %v556_v29  ;;  %v557_v34 = vsub.f32 %v520_v60, %v548_v31  ;;  %v1686_v60 = vld [vmem:[%s1818_s5 + $0x8] sm:$0xff]   ;;  %1278 = vmatprep.subr.bf16.mxu0 %v1680_v59 }
 0x1a2   : > { %v573_v35 = vpack.c.bf16 %v1620_v32, %v1618_v30 }
 0x1a3   : > { %v569_v36 = vmul.f32 1.442695, %v557_v34  ;;  %1421 = vpow2.f32 %v567_v33 }
 0x1a4   : > { %1324 = vmatprep.mubr.msk.bf16.mxu1 %vm530_vm0, %v573_v35  ;;  %1279 = vmatpush3.bf16.msra.mxu0 %v1686_v60 }
 0x1a5   : > { %1423 = vpow2.f32 %v569_v36  ;;  %v1625_v39 = vpop.eup %1417  ;;  %1280 = vmatprep.subr.bf16.mxu0 %v1692_v61 }
 0x1a6   : > { %v551_v37 = vpop.xlane.xlu0 %550 }
 0x1a7   : > { %v558_v38 = vsub.f32 %v525_v3, %v551_v37  ;;  %v1728_v3 = vld [vmem:[%s1818_s5 + $0x68] sm:$0xff]  }
 0x1a8   : > { %1281 = vmatpush3.bf16.msra.mxu0 %v1698_v62 }
 0x1a9   : > { %v1627_v40 = vpop.eup %1419  ;;  %v571_v41 = vmul.f32 1.442695, %v558_v38  ;;  %1282 = vmatprep.subr.bf16.mxu0 %v1704_v63 }
 0x1aa   : > { %v574_v42 = vpack.c.bf16 %v1627_v40, %v1625_v39 }
 0x1ab   : > { %1425 = vpow2.f32 %v571_v41 }
 0x1ac   : > { %1325 = vmatmul.mubr.msk.bf16.vlgmr.msra.gmra.mrb[0].mxu1 %vm530_vm0, %v574_v42  ;;  %1283 = vmatpush3.bf16.msra.mxu0 %v1710_v0 }
 0x1ad   : > { %v1632_v43 = vpop.eup %1421  ;;  %792 = vmatpush1.bf16.msra.mxu1 %v1385_v49  ;;  %1284 = vmatprep.subr.bf16.mxu0 %v1716_v1 }
 0x1ae   : > { %793 = vmatprep.subr.bf16.mxu1 %v1390_v50 }
 0x1af   : > { %v1634_v44 = vpop.eup %1423 }
 0x1b0   : > { %v575_v45 = vpack.c.bf16 %v1634_v44, %v1632_v43  ;;  %1285 = vmatpush3.bf16.msra.mxu0 %v1722_v2 }
 0x1b1   : > { %794 = vmatpush1.bf16.msra.mxu1 %v1388_v51  ;;  %1286 = vmatprep.subr.bf16.mxu0 %v1728_v3 }
 0x1b2   : > { %1328 = vmatprep.mubr.msk.bf16.mxu1 %vm530_vm0, %v575_v45  ;;  %795 = vmatprep.subr.bf16.mxu1 %v1393_v52 }
 0x1b4   : > { %1287 = vmatpush3.bf16.msra.mxu0 %v1734_v4 }
 0x1b5   : > { %v1639_v46 = vpop.eup %1425  ;;  %796 = vmatpush1.bf16.msra.mxu1 %v1391_v53 }
 0x1b6   : > { %v576_v47 = vpack.c.bf16 %v1639_v46, %v1639_v46  ;;  %797 = vmatprep.subr.bf16.mxu1 %v1396_v54 }
 0x1b8   : > { %1329 = vmatmul.mubr.msk.bf16.gmra.mrb[4].mxu1 %vm530_vm0, %v576_v47 }
 0x1b9   : > { %798 = vmatpush1.bf16.msra.mxu1 %v1394_v55  ;;  %823 = vmatprep.mubr.bf16.mxu1 %v1449_v56 }
 0x1ba   : > { %1332 = vmatprep.subr.bf16.mxu1 %v1397_v57 }
 0x27f   : > { %v1326_v5 = vpop.f32.mrb[0].mxu1 }
 0x280   : > { %v687_v6 = vmax.f32 %v1326_v5, 1e-30  ;;  %v655_v7 = vpop.f32.mrb[1].mxu1 }
 0x281   : > { %v685_v8 = vmax.f32 %v655_v7, 1e-30  ;;  %v1327_v9 = vpop.f32.mrb[2].mxu1 }
 0x282   : > { %1427 = vrcp.f32 %v687_v6  ;;  %v688_v10 = vmax.f32 %v1327_v9, 1e-30  ;;  %v658_v13 = vpop.f32.mrb[3].mxu1 }
 0x283   : > { %1429 = vrcp.f32 %v685_v8  ;;  %v686_v14 = vmax.f32 %v658_v13, 1e-30 }
 0x284   : > { %1431 = vrcp.f32 %v688_v10 }
 0x285   : > { %1433 = vrcp.f32 %v686_v14 }
 0x28b   : > { %v1330_v15 = vpop.f32.mrb[4].mxu1 }
 0x28c   : > { %v1428_v16 = vpop.eup %1427  ;;  %v671_v17 = vpop.f32.mrb[5].mxu1  ;;  %v691_v29 = vmax.f32 %v1330_v15, 1e-30 }
 0x28d   : > { %v1430_v18 = vpop.eup %1429  ;;  %v701_v21 = vmul.f32 %v1428_v16, %v687_v6  ;;  %v689_v22 = vmax.f32 %v671_v17, 1e-30  ;;  %v1331_v25 = vpop.f32.mrb[6].mxu1 }
 0x28e   : > { %v1432_v26 = vpop.eup %1431  ;;  %v699_v28 = vmul.f32 %v1430_v18, %v685_v8  ;;  %v674_v31 = vpop.f32.mrb[7].mxu1 }
 0x28f   : > { %v1434_v33 = vpop.eup %1433  ;;  %v708_v34 = vsub.f32 2.0, %v701_v21  ;;  %v702_v35 = vmul.f32 %v1432_v26, %v688_v10  ;;  %1435 = vrcp.f32 %v689_v22  ;;  %v690_v36 = vmax.f32 %v674_v31, 1e-30 }
 0x290   : > { %v706_v37 = vsub.f32 2.0, %v699_v28  ;;  %v700_v38 = vmul.f32 %v1434_v33, %v686_v14  ;;  %v868_v28 = vunpack.c.l.bf16 %v1571_v20  ;;  %v867_v31 = vunpack.c.h.bf16 %v1568_v19 }
 0x291   : > { %v715_v41 = vmul.f32 %v1428_v16, %v708_v34  ;;  %v709_v42 = vsub.f32 2.0, %v702_v35  ;;  %1437 = vrcp.f32 %v690_v36 }
 0x292   : > { %v713_v45 = vmul.f32 %v1430_v18, %v706_v37  ;;  %v707_v47 = vsub.f32 2.0, %v700_v38  ;;  %1439 = vrcp.f32 %v691_v29 }
 0x293   : > { %v716_v48 = vmul.f32 %v1432_v26, %v709_v42  ;;  %v722_v50 = vmul.f32 %v1625_v39, %v715_v41  ;;  %v866_v26 = vunpack.c.l.bf16 %v1568_v19  ;;  %v871_v19 = vunpack.c.h.bf16 %v1578_v23 }
 0x294   : > { %v714_v49 = vmul.f32 %v1434_v33, %v707_v47  ;;  %v720_v52 = vmul.f32 %v1618_v30, %v713_v45  ;;  %v870_v45 = vunpack.c.l.bf16 %v1578_v23  ;;  %v872_v47 = vunpack.c.l.bf16 %v1581_v24 }
 0x295   : > { %v723_v51 = vmul.f32 %v1627_v40, %v716_v48 }
 0x296   : > { %v721_v53 = vmul.f32 %v1620_v32, %v714_v49 }
 0x297   : > { %v728_v54 = vpack.c.bf16 %v723_v51, %v722_v50 }
 0x298   : > { %v727_v55 = vpack.c.bf16 %v721_v53, %v720_v52 }
 0x299   : > { %v1436_v57 = vpop.eup %1435 }
 0x29a   : > { %v703_v5 = vmul.f32 %v1436_v57, %v689_v22  ;;  %1205 = vmatmul.mubr.msk.bf16.vlgmr.msra.gmra.mrb[8].mxu1 %vm530_vm0, %v727_v55 }
 0x29b   : > { %v1438_v6 = vpop.eup %1437  ;;  %833 = vmatprep.mubr.bf16.mxu1 %v1449_v56  ;;  %1340 = vmatpush3.bf16.msra.mxu1 %v1675_v58 }
 0x29c   : > { %v710_v7 = vsub.f32 2.0, %v703_v5  ;;  %v704_v8 = vmul.f32 %v1438_v6, %v690_v36  ;;  %1333 = vmatprep.subr.bf16.mxu1 %v1680_v59  ;;  %v1440_v39 = vpop.eup %1439 }
 0x29d   : > { %v705_v32 = vmul.f32 %v1440_v39, %v691_v29 }
 0x29e   : > { %v717_v40 = vmul.f32 %v1436_v57, %v710_v7  ;;  %v711_v30 = vsub.f32 2.0, %v704_v8  ;;  %v874_v7 = vunpack.c.l.bf16 %v1588_v27 }
 0x29f   : > { %1341 = vmatpush3.bf16.msra.mxu1 %v1686_v60  ;;  %v712_v58 = vsub.f32 2.0, %v705_v32 }
 0x2a0   : > { %v718_v9 = vmul.f32 %v1438_v6, %v711_v30  ;;  %1334 = vmatprep.subr.bf16.mxu1 %v1692_v61  ;;  %v724_v10 = vmul.f32 %v1632_v43, %v717_v40  ;;  %v1409_v61 = vld [vmem:[%s1818_s5 + $0x70] sm:$0xff]   ;;  %v875_v6 = vunpack.c.h.bf16 %v1588_v27 }
 0x2a1   : > { %v719_v60 = vmul.f32 %v1440_v39, %v712_v58  ;;  %1288 = vmatprep.subr.bf16.mxu0 %v1409_v61 }
 0x2a2   : > { %v725_v13 = vmul.f32 %v1634_v44, %v718_v9  ;;  %1206 = vmatmul.mubr.msk.bf16.gmra.mrb[12].mxu1 %vm530_vm0, %v728_v54 }
 0x2a3   : > { %843 = vmatprep.mubr.bf16.mxu1 %v1449_v56  ;;  %1342 = vmatpush3.bf16.msra.mxu1 %v1698_v62  ;;  %v726_v43 = vmul.f32 %v1639_v46, %v719_v60  ;;  %v1410_v62 = vld [vmem:[%s1818_s5 + $0x30] sm:$0xff]   ;;  %v1411_v46 = vld [vmem:[%s1818_s5 + $0x78] sm:$0xff]  }
 0x2a4   : > { %v729_v59 = vpack.c.bf16 %v725_v13, %v724_v10  ;;  %1335 = vmatprep.subr.bf16.mxu1 %v1704_v63  ;;  %1289 = vmatpush3.bf16.msra.mxu0 %v1410_v62  ;;  %v862_v63 = vunpack.c.l.bf16 %v1545_v11  ;;  %v931_v13 = vstv %s930_s14 }
 0x2a5   : > { %v730_v44 = vpack.c.bf16 %v726_v43, %v726_v43  ;;  %1290 = vmatprep.subr.bf16.mxu0 %v1411_v46 }
 0x2a7   : > { %1343 = vmatpush3.bf16.msra.mxu1 %v1710_v0  ;;  %v864_v0 = vunpack.c.l.bf16 %v1548_v12 }
 0x2a8   : > { %1336 = vmatprep.subr.bf16.mxu1 %v1716_v1 }
 0x2aa   : > { %1207 = vmatmul.mubr.msk.bf16.gmra.mrb[16].mxu1 %vm530_vm0, %v729_v59 }
 0x2ab   : > { %853 = vmatprep.mubr.bf16.mxu1 %v1449_v56  ;;  %1344 = vmatpush3.bf16.msra.mxu1 %v1722_v2  ;;  %v1412_v56 = vld [vmem:[%s1818_s5 + $0x38] sm:$0xff]   ;;  %v863_v2 = vunpack.c.h.bf16 %v1545_v11  ;;  %v869_v11 = vunpack.c.h.bf16 %v1571_v20  ;;  %v873_v20 = vunpack.c.h.bf16 %v1581_v24 }
 0x2ac   : > { %1337 = vmatprep.subr.bf16.mxu1 %v1728_v3  ;;  %1291 = vmatpush3.bf16.msra.mxu0 %v1412_v56  ;;  %v865_v3 = vunpack.c.h.bf16 %v1548_v12 }
 0x2af   : > { %1345 = vmatpush3.bf16.msra.mxu1 %v1734_v4 }
 0x2b0   : > { %1338 = vmatprep.subr.bf16.mxu1 %v1409_v61 }
 0x2b2   : > { %1208 = vmatmul.mubr.msk.bf16.gmra.mrb[20].mxu1 %vm530_vm0, %v730_v44 }
 0x2b3   : > { %1346 = vmatpush3.bf16.msra.mxu1 %v1410_v62 }
 0x2b4   : > { %1339 = vmatprep.subr.bf16.mxu1 %v1411_v46 }
 0x2b7   : > { %1347 = vmatpush3.bf16.msra.mxu1 %v1412_v56 }
 0x36d   : > { %v825_v1 = vpop.f32.mrb[8].mxu1 }
 0x36e   : > { %v827_v4 = vpop.f32.mrb[9].mxu1  ;;  %v876_v15 = vmul.f32 %v862_v63, %v825_v1 }
 0x36f   : > { %v829_v14 = vpop.f32.mrb[10].mxu1  ;;  %v877_v18 = vmul.f32 %v863_v2, %v827_v4 }
 0x370   : > { %v878_v16 = vmul.f32 %v864_v0, %v829_v14  ;;  %v831_v17 = vpop.f32.mrb[11].mxu1 }
 0x371   : > { %v879_v21 = vmul.f32 %v865_v3, %v831_v17 }
 0x372   : > { %v890_v22 = vpack.c.bf16 %v878_v16, %v876_v15 }
 0x373   : > { %v891_v25 = vpack.c.bf16 %v879_v21, %v877_v18 }
 0x375   : > { %v835_v29 = vpop.f32.mrb[12].mxu1  ;;  %1060 = vmatprep.mubr.bf16.mxu0 %v891_v25 }
 0x376   : > { %v837_v12 = vpop.f32.mrb[13].mxu1  ;;  %1061 = vmatmul.mubr.bf16.vlgmr.msra.gmra.mrb[16].mxu0 %v890_v22  ;;  %v880_v34 = vmul.f32 %v866_v26, %v835_v29 }
 0x377   : > { %v839_v33 = vpop.f32.mrb[14].mxu1  ;;  %v881_v37 = vmul.f32 %v867_v31, %v837_v12 }
 0x378   : > { %v882_v35 = vmul.f32 %v868_v28, %v839_v33  ;;  %v841_v36 = vpop.f32.mrb[15].mxu1 }
 0x379   : > { %v883_v38 = vmul.f32 %v869_v11, %v841_v36 }
 0x37a   : > { %v892_v41 = vpack.c.bf16 %v882_v35, %v880_v34 }
 0x37b   : > { %v893_v42 = vpack.c.bf16 %v883_v38, %v881_v37 }
 0x37d   : > { %v845_v48 = vpop.f32.mrb[16].mxu1  ;;  %1068 = vmatprep.mubr.bf16.mxu0 %v893_v42 }
 0x37e   : > { %v847_v49 = vpop.f32.mrb[17].mxu1  ;;  %1069 = vmatmul.mubr.bf16.gmra.mrb[20].mxu0 %v892_v41  ;;  %v884_v51 = vmul.f32 %v870_v45, %v845_v48 }
 0x37f   : > { %v849_v50 = vpop.f32.mrb[18].mxu1  ;;  %v885_v54 = vmul.f32 %v871_v19, %v847_v49 }
 0x380   : > { %v886_v52 = vmul.f32 %v872_v47, %v849_v50  ;;  %v851_v53 = vpop.f32.mrb[19].mxu1 }
 0x381   : > { %v887_v55 = vmul.f32 %v873_v20, %v851_v53 }
 0x382   : > { %v894_v57 = vpack.c.bf16 %v886_v52, %v884_v51 }
 0x383   : > { %v895_v5 = vpack.c.bf16 %v887_v55, %v885_v54 }
 0x385   : > { %v855_v8 = vpop.f32.mrb[20].mxu1  ;;  %1076 = vmatprep.mubr.bf16.mxu1 %v895_v5 }
 0x386   : > { %v857_v39 = vpop.f32.mrb[21].mxu1  ;;  %1077 = vmatmul.mubr.bf16.vlgmr.msra.gmra.mrb[24].mxu1 %v894_v57  ;;  %v888_v40 = vmul.f32 %v874_v7, %v855_v8 }
 0x387   : > { %v889_v23 = vmul.f32 %v875_v6, %v857_v39  ;;  %v859_v24 = vpop.f32.mrb[22].mxu1 }
 0x388   : > { %v860_v30 = vpop.f32.mrb[23].mxu1  ;;  %v896_v9 = vpack.c.bf16 %v888_v40, %v888_v40 }
 0x389   : > { %v897_v32 = vpack.c.bf16 %v889_v23, %v889_v23 }
 0x38b   : > { %1084 = vmatprep.mubr.bf16.mxu1 %v897_v32 }
 0x38e   : > { %1085 = vmatmul.mubr.bf16.gmra.mrb[28].mxu1 %v896_v9 }
 0x449   : > { %v1292_v10 = vpop.f32.mrb[16].mxu0 }
 0x44a   : > { %v1293_v58 = vpop.f32.mrb[17].mxu0 }
 0x44b   : > { %v1294_v59 = vadd.f32 %v1293_v58, %v1292_v10  ;;  %v1295_v60 = vpop.f32.mrb[18].mxu0 }
 0x44c   : > { %v1296_v27 = vpop.f32.mrb[19].mxu0 }
 0x44d   : > { %v1063_v43 = vadd.f32 %v1294_v59, %v931_v13  ;;  %v1297_v44 = vadd.f32 %v1296_v27, %v1295_v60 }
 0x44f   : > { %1093 = vst.msk [vmem:[%s1794_s17] sm:$0xff] %vm1092_vm1, %v1063_v43  ;;  %v1066_v61 = vadd.f32 %v1297_v44, %v931_v13 }
 0x451   : > { %1094 = vst.msk [vmem:[%s1794_s17 + $0x8] sm:$0xff] %vm1092_vm1, %v1066_v61  ;;  %v1298_v62 = vpop.f32.mrb[20].mxu0 }
 0x452   : > { %v1299_v46 = vpop.f32.mrb[21].mxu0 }
 0x453   : > { %v1300_v56 = vadd.f32 %v1299_v46, %v1298_v62  ;;  %v1301_v63 = vpop.f32.mrb[22].mxu0 }
 0x454   : > { %v1302_v0 = vpop.f32.mrb[23].mxu0 }
 0x455   : > { %v1071_v1 = vadd.f32 %v1300_v56, %v931_v13  ;;  %v1303_v2 = vadd.f32 %v1302_v0, %v1301_v63 }
 0x457   : > { %1095 = vst.msk [vmem:[%s1794_s17 + $0x10] sm:$0xff] %vm1092_vm1, %v1071_v1  ;;  %v1074_v3 = vadd.f32 %v1303_v2, %v931_v13 }
 0x459   : > { %1096 = vst.msk [vmem:[%s1794_s17 + $0x18] sm:$0xff] %vm1092_vm1, %v1074_v3  ;;  %v1304_v4 = vpop.f32.mrb[24].mxu1 }
 0x45a   : > { %v1305_v14 = vpop.f32.mrb[25].mxu1 }
 0x45b   : > { %v1306_v15 = vadd.f32 %v1305_v14, %v1304_v4  ;;  %v1307_v16 = vpop.f32.mrb[26].mxu1 }
 0x45c   : > { %v1308_v17 = vpop.f32.mrb[27].mxu1 }
 0x45d   : > { %v1079_v18 = vadd.f32 %v1306_v15, %v931_v13  ;;  %v1309_v21 = vadd.f32 %v1308_v17, %v1307_v16 }
 0x45f   : > { %1097 = vst.msk [vmem:[%s1794_s17 + $0x20] sm:$0xff] %vm1092_vm1, %v1079_v18  ;;  %v1082_v22 = vadd.f32 %v1309_v21, %v931_v13 }
 0x461   : > { %1098 = vst.msk [vmem:[%s1794_s17 + $0x28] sm:$0xff] %vm1092_vm1, %v1082_v22  ;;  %v1310_v25 = vpop.f32.mrb[28].mxu1 }
 0x462   : > { %v1311_v26 = vpop.f32.mrb[29].mxu1 }
 0x463   : > { %v1312_v28 = vadd.f32 %v1311_v26, %v1310_v25  ;;  %v1313_v29 = vpop.f32.mrb[30].mxu1 }
 0x464   : > { %v1314_v31 = vpop.f32.mrb[31].mxu1 }
 0x465   : > { %v1087_v11 = vadd.f32 %v1312_v28, %v931_v13 }
 0x467   : > { %1099 = vst.msk [vmem:[%s1794_s17 + $0x30] sm:$0xff] %vm1092_vm1, %v1087_v11 }
 0x468 PF: > { %s18_s26 = sadd.s32 1, %s1447_s26  }
 0x469   : > { %p15_p4 = scmp.ge.s32.totalorder %s18_s26, 4  }
 0x46b   :  { %17 = sbr.rel (!%p15_p4) target bundleno = 2 (0x2), region = 78 }

</bundles_post_ra>
